<compile_context>
chip_gen: v7x
topology: tpu7x:2x2x1
jax: 0.10.0
libtpu: 0.0.40
codegen_flags: <defaults>
</compile_context>

<pallas_src>
import jax
import jax.numpy as jnp
from jax.experimental import pallas as pl
from jax.experimental.pallas import tpu as pltpu


LANE = 128  # pad every feature dim to the 128-wide lane axis


def _round_up(n, m):
    return ((n + m - 1) // m) * m


def dqn_kernel(x_ref,
               w_in_ref, b_in_ref,
               w_h1_ref, b_h1_ref,
               w_h2_ref, b_h2_ref,
               w_h3_ref, b_h3_ref,
               w_h4_ref, b_h4_ref,
               w_out_ref, b_out_ref,
               o_ref):
    def linear(v, w_ref, b_ref):
        # bf16 MXU inputs, f32 accumulation; bias add (and everything
        # downstream: ReLU, residual adds) stays in f32 on the VPU.
        return jnp.dot(v.astype(jnp.bfloat16), w_ref[...],
                       preferred_element_type=jnp.float32) + b_ref[...]

    # input_layer + relu
    h = jnp.maximum(linear(x_ref[...], w_in_ref, b_in_ref), 0.0)
    residual = h
    # hidden_layer1 + relu
    h = jnp.maximum(linear(h, w_h1_ref, b_h1_ref), 0.0)
    # hidden_layer2 + relu
    h = jnp.maximum(linear(h, w_h2_ref, b_h2_ref), 0.0)
    # residual add (dropout = identity in eval mode)
    h = h + residual
    residual = h
    # hidden_layer3 + relu
    h = jnp.maximum(linear(h, w_h3_ref, b_h3_ref), 0.0)
    # hidden_layer4 + relu
    h = jnp.maximum(linear(h, w_h4_ref, b_h4_ref), 0.0)
    # residual add (dropout = identity in eval mode)
    h = h + residual
    # output_layer (no activation); lane-dense (padded to 128) output block
    o_ref[...] = linear(h, w_out_ref, b_out_ref).astype(o_ref.dtype)


def dqn_forward(x, params, *, block_rows=512):
    """x: (B, input_size) float32. params: unpadded f32 (in,out) weights, (1,out) biases."""
    B, input_size = x.shape
    hidden = params["w_in"].shape[1]
    hidden2 = params["w_h1"].shape[1]
    out_size = params["w_out"].shape[1]

    in_p = _round_up(input_size, LANE)
    h_p = _round_up(hidden, LANE)
    h2_p = _round_up(hidden2, LANE)
    out_p = _round_up(out_size, LANE)

    # block_rows: multiple of 8, no bigger than the (sublane-padded) batch.
    block_rows = max(8, min(block_rows, _round_up(B, 8)))
    block_rows = _round_up(block_rows, 8)
    b_pad = _round_up(B, block_rows)
    num_tiles = b_pad // block_rows

    def pad_w(w, rows, cols):
        return jnp.pad(w, ((0, rows - w.shape[0]),
                           (0, cols - w.shape[1]))).astype(jnp.bfloat16)

    def pad_b(b, cols):
        return jnp.pad(b, ((0, 0), (0, cols - b.shape[1]))).astype(jnp.float32)

    # Zero padding keeps semantics exact: padded input cols hit zero weight
    # rows, padded hidden units get zero bias -> relu(0)=0 feeds zero weight
    # rows downstream.
    x_p = jnp.pad(x, ((0, b_pad - B), (0, in_p - input_size))).astype(jnp.bfloat16)

    args = (
        x_p,
        pad_w(params["w_in"], in_p, h_p),   pad_b(params["b_in"], h_p),
        pad_w(params["w_h1"], h_p, h2_p),   pad_b(params["b_h1"], h2_p),
        pad_w(params["w_h2"], h2_p, h_p),   pad_b(params["b_h2"], h_p),
        pad_w(params["w_h3"], h_p, h_p),    pad_b(params["b_h3"], h_p),
        pad_w(params["w_h4"], h_p, h_p),    pad_b(params["b_h4"], h_p),
        pad_w(params["w_out"], h_p, out_p), pad_b(params["b_out"], out_p),
    )

    # Full array as one block with constant block index => stays VMEM-resident
    # across grid steps (Pallas skips the re-DMA when the block index repeats).
    in_specs = [pl.BlockSpec((block_rows, in_p), lambda i: (i, 0))]
    in_specs += [pl.BlockSpec(a.shape, lambda i: (0, 0)) for a in args[1:]]
    out_spec = pl.BlockSpec((block_rows, out_p), lambda i: (i, 0))

    flops = 2 * b_pad * (in_p * h_p + h_p * h2_p + h2_p * h_p
                         + h_p * h_p + h_p * h_p + h_p * out_p)
    bytes_accessed = (sum(int(a.size) * a.dtype.itemsize for a in args)
                      + b_pad * out_p * 4)
    cost = pl.CostEstimate(flops=flops, transcendentals=0,
                           bytes_accessed=bytes_accessed)

    out_padded = pl.pallas_call(
        dqn_kernel,
        out_shape=jax.ShapeDtypeStruct((b_pad, out_p), jnp.float32),
        grid=(num_tiles,),
        in_specs=in_specs,
        out_specs=out_spec,
        compiler_params=pltpu.CompilerParams(
            dimension_semantics=("parallel",)),
        cost_estimate=cost,
    )(*args)

    return out_padded[:B, :out_size]


def init_params(key, input_size, hidden_size, output_size):
    """Deterministic init mimicking nn.Linear's U(-1/sqrt(fan_in), 1/sqrt(fan_in))."""
    dims = [
        ("in",  input_size,      hidden_size),
        ("h1",  hidden_size,     hidden_size * 2),
        ("h2",  hidden_size * 2, hidden_size),
        ("h3",  hidden_size,     hidden_size),
        ("h4",  hidden_size,     hidden_size),
        ("out", hidden_size,     output_size),
    ]
    params = {}
    for name, fan_in, fan_out in dims:
        key, kw, kb = jax.random.split(key, 3)
        bound = 1.0 / jnp.sqrt(jnp.float32(fan_in))
        # stored as (in, out) == PyTorch weight (out, in) transposed
        params[f"w_{name}"] = jax.random.uniform(
            kw, (fan_in, fan_out), jnp.float32, -bound, bound)
        params[f"b_{name}"] = jax.random.uniform(
            kb, (1, fan_out), jnp.float32, -bound, bound)
    return params


def dqn_reference(x, params):
    """Pure-JAX reference with the same dtype policy as the kernel
    (bf16 MXU inputs, f32 accumulation and f32 elementwise)."""
    def lin(v, w, b):
        return jnp.dot(v.astype(jnp.bfloat16), w.astype(jnp.bfloat16),
                       preferred_element_type=jnp.float32) + b
    h = jax.nn.relu(lin(x, params["w_in"], params["b_in"]))
    res = h
    h = jax.nn.relu(lin(h, params["w_h1"], params["b_h1"]))
    h = jax.nn.relu(lin(h, params["w_h2"], params["b_h2"]))
    h = h + res
    res = h
    h = jax.nn.relu(lin(h, params["w_h3"], params["b_h3"]))
    h = jax.nn.relu(lin(h, params["w_h4"], params["b_h4"]))
    h = h + res
    return lin(h, params["w_out"], params["b_out"])


if __name__ == "__main__":
    key = jax.random.PRNGKey(0)
    batch = 33           # non-multiple of the tile: exercises batch padding + a 2-step grid
    input_size = 16
    hidden_size = 32
    output_size = 4

    kx, kp = jax.random.split(key)
    x = jax.random.normal(kx, (batch, input_size), jnp.float32)
    params = init_params(kp, input_size, hidden_size, output_size)

    out = dqn_forward(x, params, block_rows=32)
    out = jax.block_until_ready(out)

    ref = dqn_reference(x, params)
    assert out.shape == (batch, output_size)
    max_err = float(jnp.max(jnp.abs(out - ref)))
    assert jnp.allclose(out, ref, atol=2e-2, rtol=2e-2), f"mismatch vs reference (max err {max_err})"

    print("KERNEL_OK")
</pallas_src>

<mosaic_0001>
module attributes {stable_mosaic.version = 11 : i64} {
  func.func @dqn_kernel(%arg0: i32, %arg1: memref<32x128xbf16, #tpu.memory_space<vmem>>, %arg2: memref<128x128xbf16, #tpu.memory_space<vmem>>, %arg3: memref<1x128xf32, #tpu.memory_space<vmem>>, %arg4: memref<128x128xbf16, #tpu.memory_space<vmem>>, %arg5: memref<1x128xf32, #tpu.memory_space<vmem>>, %arg6: memref<128x128xbf16, #tpu.memory_space<vmem>>, %arg7: memref<1x128xf32, #tpu.memory_space<vmem>>, %arg8: memref<128x128xbf16, #tpu.memory_space<vmem>>, %arg9: memref<1x128xf32, #tpu.memory_space<vmem>>, %arg10: memref<128x128xbf16, #tpu.memory_space<vmem>>, %arg11: memref<1x128xf32, #tpu.memory_space<vmem>>, %arg12: memref<128x128xbf16, #tpu.memory_space<vmem>>, %arg13: memref<1x128xf32, #tpu.memory_space<vmem>>, %arg14: memref<32x128xf32, #tpu.memory_space<vmem>>) attributes {dimension_semantics = [#tpu.dimension_semantics<parallel>], iteration_bounds = array<i64: 2>, scalar_prefetch = 0 : i64, scratch_operands = 0 : i64, tpu.core_type = #tpu.core_type<tc>, window_params = [{transform_indices = @transform_0, window_bounds = array<i64: 32, 128>}, {pipeline_mode = #tpu.pipeline_mode<synchronous>, transform_indices = @transform_1, window_bounds = array<i64: 128, 128>}, {pipeline_mode = #tpu.pipeline_mode<synchronous>, transform_indices = @transform_2, window_bounds = array<i64: 1, 128>}, {pipeline_mode = #tpu.pipeline_mode<synchronous>, transform_indices = @transform_3, window_bounds = array<i64: 128, 128>}, {pipeline_mode = #tpu.pipeline_mode<synchronous>, transform_indices = @transform_4, window_bounds = array<i64: 1, 128>}, {pipeline_mode = #tpu.pipeline_mode<synchronous>, transform_indices = @transform_5, window_bounds = array<i64: 128, 128>}, {pipeline_mode = #tpu.pipeline_mode<synchronous>, transform_indices = @transform_6, window_bounds = array<i64: 1, 128>}, {pipeline_mode = #tpu.pipeline_mode<synchronous>, transform_indices = @transform_7, window_bounds = array<i64: 128, 128>}, {pipeline_mode = #tpu.pipeline_mode<synchronous>, transform_indices = @transform_8, window_bounds = array<i64: 1, 128>}, {pipeline_mode = #tpu.pipeline_mode<synchronous>, transform_indices = @transform_9, window_bounds = array<i64: 128, 128>}, {pipeline_mode = #tpu.pipeline_mode<synchronous>, transform_indices = @transform_10, window_bounds = array<i64: 1, 128>}, {pipeline_mode = #tpu.pipeline_mode<synchronous>, transform_indices = @transform_11, window_bounds = array<i64: 128, 128>}, {pipeline_mode = #tpu.pipeline_mode<synchronous>, transform_indices = @transform_12, window_bounds = array<i64: 1, 128>}, {transform_indices = @transform_13, window_bounds = array<i64: 32, 128>}]} {
    %c0 = arith.constant 0 : index
    %c0_0 = arith.constant 0 : index
    %0 = vector.load %arg1[%c0, %c0_0] : memref<32x128xbf16, #tpu.memory_space<vmem>>, vector<32x128xbf16>
    %c0_1 = arith.constant 0 : index
    %c0_2 = arith.constant 0 : index
    %1 = vector.load %arg2[%c0_1, %c0_2] : memref<128x128xbf16, #tpu.memory_space<vmem>>, vector<128x128xbf16>
    %cst = arith.constant dense<0.000000e+00> : vector<32x128xf32>
    %2 = tpu.matmul %0, %1, %cst {dimension_numbers = #tpu.dot_dimension_numbers<[1], [0], [0], [1], [0, 0, 1, 1], [], []>} : vector<32x128xbf16>, vector<128x128xbf16>, vector<32x128xf32> -> vector<32x128xf32>
    %c0_3 = arith.constant 0 : index
    %c0_4 = arith.constant 0 : index
    %3 = vector.load %arg3[%c0_3, %c0_4] : memref<1x128xf32, #tpu.memory_space<vmem>>, vector<1x128xf32>
    %4 = vector.broadcast %3 : vector<1x128xf32> to vector<32x128xf32>
    %5 = arith.addf %2, %4 : vector<32x128xf32>
    %cst_5 = arith.constant 0.000000e+00 : f32
    %6 = vector.broadcast %cst_5 : f32 to vector<32x128xf32>
    %7 = arith.maximumf %5, %6 : vector<32x128xf32>
    %8 = arith.truncf %7 : vector<32x128xf32> to vector<32x128xbf16>
    %c0_6 = arith.constant 0 : index
    %c0_7 = arith.constant 0 : index
    %9 = vector.load %arg4[%c0_6, %c0_7] : memref<128x128xbf16, #tpu.memory_space<vmem>>, vector<128x128xbf16>
    %cst_8 = arith.constant dense<0.000000e+00> : vector<32x128xf32>
    %10 = tpu.matmul %8, %9, %cst_8 {dimension_numbers = #tpu.dot_dimension_numbers<[1], [0], [0], [1], [0, 0, 1, 1], [], []>} : vector<32x128xbf16>, vector<128x128xbf16>, vector<32x128xf32> -> vector<32x128xf32>
    %c0_9 = arith.constant 0 : index
    %c0_10 = arith.constant 0 : index
    %11 = vector.load %arg5[%c0_9, %c0_10] : memref<1x128xf32, #tpu.memory_space<vmem>>, vector<1x128xf32>
    %12 = vector.broadcast %11 : vector<1x128xf32> to vector<32x128xf32>
    %13 = arith.addf %10, %12 : vector<32x128xf32>
    %cst_11 = arith.constant 0.000000e+00 : f32
    %14 = vector.broadcast %cst_11 : f32 to vector<32x128xf32>
    %15 = arith.maximumf %13, %14 : vector<32x128xf32>
    %16 = arith.truncf %15 : vector<32x128xf32> to vector<32x128xbf16>
    %c0_12 = arith.constant 0 : index
    %c0_13 = arith.constant 0 : index
    %17 = vector.load %arg6[%c0_12, %c0_13] : memref<128x128xbf16, #tpu.memory_space<vmem>>, vector<128x128xbf16>
    %cst_14 = arith.constant dense<0.000000e+00> : vector<32x128xf32>
    %18 = tpu.matmul %16, %17, %cst_14 {dimension_numbers = #tpu.dot_dimension_numbers<[1], [0], [0], [1], [0, 0, 1, 1], [], []>} : vector<32x128xbf16>, vector<128x128xbf16>, vector<32x128xf32> -> vector<32x128xf32>
    %c0_15 = arith.constant 0 : index
    %c0_16 = arith.constant 0 : index
    %19 = vector.load %arg7[%c0_15, %c0_16] : memref<1x128xf32, #tpu.memory_space<vmem>>, vector<1x128xf32>
    %20 = vector.broadcast %19 : vector<1x128xf32> to vector<32x128xf32>
    %21 = arith.addf %18, %20 : vector<32x128xf32>
    %cst_17 = arith.constant 0.000000e+00 : f32
    %22 = vector.broadcast %cst_17 : f32 to vector<32x128xf32>
    %23 = arith.maximumf %21, %22 : vector<32x128xf32>
    %24 = arith.addf %23, %7 : vector<32x128xf32>
    %25 = arith.truncf %24 : vector<32x128xf32> to vector<32x128xbf16>
    %c0_18 = arith.constant 0 : index
    %c0_19 = arith.constant 0 : index
    %26 = vector.load %arg8[%c0_18, %c0_19] : memref<128x128xbf16, #tpu.memory_space<vmem>>, vector<128x128xbf16>
    %cst_20 = arith.constant dense<0.000000e+00> : vector<32x128xf32>
    %27 = tpu.matmul %25, %26, %cst_20 {dimension_numbers = #tpu.dot_dimension_numbers<[1], [0], [0], [1], [0, 0, 1, 1], [], []>} : vector<32x128xbf16>, vector<128x128xbf16>, vector<32x128xf32> -> vector<32x128xf32>
    %c0_21 = arith.constant 0 : index
    %c0_22 = arith.constant 0 : index
    %28 = vector.load %arg9[%c0_21, %c0_22] : memref<1x128xf32, #tpu.memory_space<vmem>>, vector<1x128xf32>
    %29 = vector.broadcast %28 : vector<1x128xf32> to vector<32x128xf32>
    %30 = arith.addf %27, %29 : vector<32x128xf32>
    %cst_23 = arith.constant 0.000000e+00 : f32
    %31 = vector.broadcast %cst_23 : f32 to vector<32x128xf32>
    %32 = arith.maximumf %30, %31 : vector<32x128xf32>
    %33 = arith.truncf %32 : vector<32x128xf32> to vector<32x128xbf16>
    %c0_24 = arith.constant 0 : index
    %c0_25 = arith.constant 0 : index
    %34 = vector.load %arg10[%c0_24, %c0_25] : memref<128x128xbf16, #tpu.memory_space<vmem>>, vector<128x128xbf16>
    %cst_26 = arith.constant dense<0.000000e+00> : vector<32x128xf32>
    %35 = tpu.matmul %33, %34, %cst_26 {dimension_numbers = #tpu.dot_dimension_numbers<[1], [0], [0], [1], [0, 0, 1, 1], [], []>} : vector<32x128xbf16>, vector<128x128xbf16>, vector<32x128xf32> -> vector<32x128xf32>
    %c0_27 = arith.constant 0 : index
    %c0_28 = arith.constant 0 : index
    %36 = vector.load %arg11[%c0_27, %c0_28] : memref<1x128xf32, #tpu.memory_space<vmem>>, vector<1x128xf32>
    %37 = vector.broadcast %36 : vector<1x128xf32> to vector<32x128xf32>
    %38 = arith.addf %35, %37 : vector<32x128xf32>
    %cst_29 = arith.constant 0.000000e+00 : f32
    %39 = vector.broadcast %cst_29 : f32 to vector<32x128xf32>
    %40 = arith.maximumf %38, %39 : vector<32x128xf32>
    %41 = arith.addf %40, %24 : vector<32x128xf32>
    %42 = arith.truncf %41 : vector<32x128xf32> to vector<32x128xbf16>
    %c0_30 = arith.constant 0 : index
    %c0_31 = arith.constant 0 : index
    %43 = vector.load %arg12[%c0_30, %c0_31] : memref<128x128xbf16, #tpu.memory_space<vmem>>, vector<128x128xbf16>
    %cst_32 = arith.constant dense<0.000000e+00> : vector<32x128xf32>
    %44 = tpu.matmul %42, %43, %cst_32 {dimension_numbers = #tpu.dot_dimension_numbers<[1], [0], [0], [1], [0, 0, 1, 1], [], []>} : vector<32x128xbf16>, vector<128x128xbf16>, vector<32x128xf32> -> vector<32x128xf32>
    %c0_33 = arith.constant 0 : index
    %c0_34 = arith.constant 0 : index
    %45 = vector.load %arg13[%c0_33, %c0_34] : memref<1x128xf32, #tpu.memory_space<vmem>>, vector<1x128xf32>
    %46 = vector.broadcast %45 : vector<1x128xf32> to vector<32x128xf32>
    %47 = arith.addf %44, %46 : vector<32x128xf32>
    %c0_35 = arith.constant 0 : index
    %c0_36 = arith.constant 0 : index
    %48 = vector.load %arg14[%c0_35, %c0_36] : memref<32x128xf32, #tpu.memory_space<vmem>>, vector<32x128xf32>
    tpu.vector_store %arg14[%c0_35, %c0_36], %47 {strides = array<i32>} : memref<32x128xf32, #tpu.memory_space<vmem>>, vector<32x128xf32>,
    return
  }
  func.func @transform_0(%arg0: i32) -> (i32, i32) {
    %c0_i32 = arith.constant 0 : i32
    %c0_i32_0 = arith.constant 0 : i32
    return %arg0, %c0_i32 : i32, i32
  }
  func.func @transform_1(%arg0: i32) -> (i32, i32) {
    %c0_i32 = arith.constant 0 : i32
    %c0_i32_0 = arith.constant 0 : i32
    %c0_i32_1 = arith.constant 0 : i32
    return %c0_i32, %c0_i32_0 : i32, i32
  }
  func.func @transform_2(%arg0: i32) -> (i32, i32) {
    %c0_i32 = arith.constant 0 : i32
    %c0_i32_0 = arith.constant 0 : i32
    %c0_i32_1 = arith.constant 0 : i32
    return %c0_i32, %c0_i32_0 : i32, i32
  }
  func.func @transform_3(%arg0: i32) -> (i32, i32) {
    %c0_i32 = arith.constant 0 : i32
    %c0_i32_0 = arith.constant 0 : i32
    %c0_i32_1 = arith.constant 0 : i32
    return %c0_i32, %c0_i32_0 : i32, i32
  }
  func.func @transform_4(%arg0: i32) -> (i32, i32) {
    %c0_i32 = arith.constant 0 : i32
    %c0_i32_0 = arith.constant 0 : i32
    %c0_i32_1 = arith.constant 0 : i32
    return %c0_i32, %c0_i32_0 : i32, i32
  }
  func.func @transform_5(%arg0: i32) -> (i32, i32) {
    %c0_i32 = arith.constant 0 : i32
    %c0_i32_0 = arith.constant 0 : i32
    %c0_i32_1 = arith.constant 0 : i32
    return %c0_i32, %c0_i32_0 : i32, i32
  }
  func.func @transform_6(%arg0: i32) -> (i32, i32) {
    %c0_i32 = arith.constant 0 : i32
    %c0_i32_0 = arith.constant 0 : i32
    %c0_i32_1 = arith.constant 0 : i32
    return %c0_i32, %c0_i32_0 : i32, i32
  }
  func.func @transform_7(%arg0: i32) -> (i32, i32) {
    %c0_i32 = arith.constant 0 : i32
    %c0_i32_0 = arith.constant 0 : i32
    %c0_i32_1 = arith.constant 0 : i32
    return %c0_i32, %c0_i32_0 : i32, i32
  }
  func.func @transform_8(%arg0: i32) -> (i32, i32) {
    %c0_i32 = arith.constant 0 : i32
    %c0_i32_0 = arith.constant 0 : i32
    %c0_i32_1 = arith.constant 0 : i32
    return %c0_i32, %c0_i32_0 : i32, i32
  }
  func.func @transform_9(%arg0: i32) -> (i32, i32) {
    %c0_i32 = arith.constant 0 : i32
    %c0_i32_0 = arith.constant 0 : i32
    %c0_i32_1 = arith.constant 0 : i32
    return %c0_i32, %c0_i32_0 : i32, i32
  }
  func.func @transform_10(%arg0: i32) -> (i32, i32) {
    %c0_i32 = arith.constant 0 : i32
    %c0_i32_0 = arith.constant 0 : i32
    %c0_i32_1 = arith.constant 0 : i32
    return %c0_i32, %c0_i32_0 : i32, i32
  }
  func.func @transform_11(%arg0: i32) -> (i32, i32) {
    %c0_i32 = arith.constant 0 : i32
    %c0_i32_0 = arith.constant 0 : i32
    %c0_i32_1 = arith.constant 0 : i32
    return %c0_i32, %c0_i32_0 : i32, i32
  }
  func.func @transform_12(%arg0: i32) -> (i32, i32) {
    %c0_i32 = arith.constant 0 : i32
    %c0_i32_0 = arith.constant 0 : i32
    %c0_i32_1 = arith.constant 0 : i32
    return %c0_i32, %c0_i32_0 : i32, i32
  }
  func.func @transform_13(%arg0: i32) -> (i32, i32) {
    %c0_i32 = arith.constant 0 : i32
    %c0_i32_0 = arith.constant 0 : i32
    return %arg0, %c0_i32 : i32, i32
  }
}

</mosaic_0001>

<bundles_post_ra>
// kernel: tpu_custom_call.1
= control target key start
LH: loop header
LB: loop body
LE: loop exit
PB: predicated region body
PF: predicated region fallthrough
CT: control target
= control target key end

     0   :  { %s2669_s0 = inlined_call_operand.hbm [shape: bf16[64,128], index: 0, kind: input, shape index: {}]   ;;  %s2670_s1 = inlined_call_operand.hbm [shape: bf16[128,128], index: 1, kind: input, shape index: {}]   ;;  %s2671_s2 = inlined_call_operand.vmem [shape: f32[1,128], index: 2, kind: input, shape index: {}]   ;;  %s2672_s3 = inlined_call_operand.hbm [shape: bf16[128,128], index: 3, kind: input, shape index: {}]   ;;  %s2673_s4 = inlined_call_operand.vmem [shape: f32[1,128], index: 4, kind: input, shape index: {}]   ;;  %s2674_s5 = inlined_call_operand.hbm [shape: bf16[128,128], index: 5, kind: input, shape index: {}]   ;;  %s2675_s6 = inlined_call_operand.vmem [shape: f32[1,128], index: 6, kind: input, shape index: {}]   ;;  %s2676_s7 = inlined_call_operand.hbm [shape: bf16[128,128], index: 7, kind: input, shape index: {}]   ;;  %s2677_s8 = inlined_call_operand.vmem [shape: f32[1,128], index: 8, kind: input, shape index: {}]   ;;  %s2678_s9 = inlined_call_operand.hbm [shape: bf16[128,128], index: 9, kind: input, shape index: {}]   ;;  %s2679_s10 = inlined_call_operand.vmem [shape: f32[1,128], index: 10, kind: input, shape index: {}]   ;;  %s2680_s11 = inlined_call_operand.hbm [shape: bf16[128,128], index: 11, kind: input, shape index: {}]   ;;  %s2681_s12 = inlined_call_operand.vmem [shape: f32[1,128], index: 12, kind: input, shape index: {}]   ;;  %s2682_s13 = inlined_call_operand.hbm [shape: f32[64,128], index: 13, kind: output, shape index: {}]  }
   0x1   :  { %2688 = sst [smem:[#allocation20_spill]] %s2670_s1 }
   0x2   :  { %2689 = sst [smem:[#allocation21_spill]] %s2675_s6 }
   0x3   :  { %2690 = sst [smem:[#allocation22_spill]] %s2677_s8 }
   0x4   :  { %2691 = sst [smem:[#allocation23_spill]] %s2679_s10 }
   0x5   :  { %2692 = sst [smem:[#allocation24_spill]] %s2681_s12 }
   0x6   :  { %2693 = sst [smem:[#allocation25_spill]] %s2682_s13 }
   0x7   :  { %18 = vsyncpa [#allocation3], 0 }
   0x8   :  { %20 = vsyncpa [#allocation3 + $0x1], 0 }
   0x9   :  { %21 = vsyncpa [#allocation6], 0 }
   0xa   :  { %22 = vsyncpa [#allocation9], 0 }
   0xb   :  { %23 = vsyncpa [#allocation12], 0 }
   0xc   :  { %24 = vsyncpa [#allocation4], 0 }
   0xd   :  { %26 = vsyncpa [#allocation4 + $0x1], 0  ;;  %s2256_s25 = smov 0   ;;  %s2258_s26 = smov 0  }
   0xe   :  { %s2260_s27 = smov 0   ;;  %s2262_s28 = smov 0  }
   0xf LB: > { %s2174_s29 = smov [#allocation5]   ;;  %s2277_s14 = sadd.s32 4294967295, %s2172_s28   ;;  %s2172_s28 = sphi %s2262_s28, %s2723_s28   ;;  %s2168_s27 = sphi %s2260_s27, %s2722_s27   ;;  %s2164_s26 = sphi %s2258_s26, %s2721_s26   ;;  %s2160_s25 = sphi %s2256_s25, %s2720_s25  }
  0x10   : > { %s353_s30 = sshll.u32 %s2174_s29, 4  ;;  %p1472_p0 = scmp.ge.s32.totalorder %s2172_s28, 1  ;;  %s2282_s30 = int_to_ptr.vmem [resolvable:$true] %s353_s30 }
  0x11   : > { %p2684_p1 = scmp.eq.s32.totalorder %s2277_s14, 0  ;;  %p341_p2 = scmp.lt.s32.totalorder %s2172_s28, 3 }
  0x12   : > { %s2175_s16 = smov [#allocation8]   ;;  %s2176_s19 = smov [#allocation11]  }
  0x13   : > { %p2284_p3 = pnand %p1472_p0, %p341_p2  ;;  %s385_s17 = sshll.u32 %s2175_s16, 4  ;;  %s2297_s17 = int_to_ptr.vmem [resolvable:$true] %s385_s17 }
  0x14   : > { %s417_s20 = sshll.u32 %s2176_s19, 4  ;;  %s2696_s1 = sld [smem:[#allocation20_spill]]  ;;  %s2299_s20 = int_to_ptr.vmem [resolvable:$true] %s417_s20 }
  0x15   : > { %s2694_s15 = scalar_select %p2284_p3, 1, 0 }
  0x16   : > { %p1763_p5 = pneg %p2284_p3 }
  0x18   : > { %p2293_p6 = pnand %p1763_p5, %p2684_p1 }
  0x1a   : > { %s1896_s23 = scalar_lea.hbm %s2696_s1, 1024  ;;  %p2309_p8 = pneg %p2293_p6 }
  0x1b   : > { %p1897_p7 = scmp.ne.s32.totalorder %s2696_s1, %s1896_s23  ;;  %p1903_p11 = scmp.lt.u32.totalorder %s1896_s23, %s2696_s1 }
  0x1d   : > { %p1899_p9 = pnand %p2309_p8, %p1897_p7 }
  0x1f   : > { %p1900_p10 = pneg %p1899_p9 }
  0x21   : > { %p1905_p12 = pnand %p1903_p11, %p1900_p10 }
  0x23   : > { %1908 = shalt.err (!%p1905_p12)
}
  0x24   : > { %s1909_s21 = scalar_lea.vmem %s2282_s30, 1024  ;;  %p1917_p5 = scmp.lt.s32.totalorder %s2282_s30, %s2282_s30 }
  0x25   : > { %p1910_p13 = scmp.ne.s32.totalorder %s2282_s30, %s1909_s21  ;;  %p1918_p4 = scmp.lt.s32.totalorder %s1909_s21, %s1909_s21 }
  0x27   : > { %p1912_p0 = pnand %p1910_p13, %p2309_p8  ;;  %p1919_p7 = por %p1918_p4, %p1917_p5 }
  0x29   : > { %p1913_p2 = pneg %p1912_p0 }
  0x2b   : > { %p1920_p9 = pnand %p1919_p7, %p1913_p2 }
  0x2d   : > { %1923 = shalt.err (!%p1920_p9)
}
  0x2e   : > { %s2686_s22 = smov 64   ;;  %s2178_s13 = smov 4  }
  0x2f   : > { %1766 = dma.hbm_to_vmem [thread:$0]  (!%p2293_p6), %s2696_s1, 1024, %s2282_s30, [#allocation6], %s2686_s22, %s2686_s22, %s2178_s13  }
  0x30   : > { %s1924_s21 = scalar_lea.hbm %s2674_s5, 1024 }
  0x31   : > { %p1925_p4 = scmp.ne.s32.totalorder %s2674_s5, %s1924_s21  ;;  %p1931_p12 = scmp.lt.u32.totalorder %s1924_s21, %s2674_s5 }
  0x33   : > { %p1927_p10 = pnand %p1925_p4, %p2309_p8 }
  0x35   : > { %p1928_p11 = pneg %p1927_p10 }
  0x37   : > { %p1933_p13 = pnand %p1931_p12, %p1928_p11 }
  0x39   : > { %1936 = shalt.err (!%p1933_p13)
}
  0x3a   : > { %s1937_s30 = scalar_lea.vmem %s2297_s17, 1024  ;;  %p1945_p7 = scmp.lt.s32.totalorder %s2297_s17, %s2297_s17 }
  0x3b   : > { %p1938_p0 = scmp.ne.s32.totalorder %s2297_s17, %s1937_s30  ;;  %p1946_p9 = scmp.lt.s32.totalorder %s1937_s30, %s1937_s30 }
  0x3d   : > { %p1940_p2 = pnand %p1938_p0, %p2309_p8  ;;  %p1947_p4 = por %p1946_p9, %p1945_p7 }
  0x3f   : > { %p1941_p5 = pneg %p1940_p2 }
  0x41   : > { %p1948_p10 = pnand %p1947_p4, %p1941_p5 }
  0x43   : > { %1951 = shalt.err (!%p1948_p10)
}
  0x44   : > { %1772 = dma.hbm_to_vmem [thread:$0]  (!%p2293_p6), %s2674_s5, 1024, %s2297_s17, [#allocation9], %s2686_s22, %s2686_s22, %s2178_s13  }
  0x45   : > { %s1952_s23 = scalar_lea.hbm %s2678_s9, 1024 }
  0x46   : > { %p1953_p11 = scmp.ne.s32.totalorder %s2678_s9, %s1952_s23  ;;  %p1959_p0 = scmp.lt.u32.totalorder %s1952_s23, %s2678_s9 }
  0x48   : > { %p1955_p12 = pnand %p1953_p11, %p2309_p8 }
  0x4a   : > { %p1956_p13 = pneg %p1955_p12 }
  0x4c   : > { %p1961_p2 = pnand %p1959_p0, %p1956_p13 }
  0x4e   : > { %1964 = shalt.err (!%p1961_p2)
}
  0x4f   : > { %s1965_s17 = scalar_lea.vmem %s2299_s20, 1024  ;;  %p1973_p4 = scmp.lt.s32.totalorder %s2299_s20, %s2299_s20 }
  0x50   : > { %p1966_p5 = scmp.ne.s32.totalorder %s2299_s20, %s1965_s17  ;;  %p1974_p10 = scmp.lt.s32.totalorder %s1965_s17, %s1965_s17 }
  0x52   : > { %p1968_p7 = pnand %p1966_p5, %p2309_p8  ;;  %p1975_p11 = por %p1974_p10, %p1973_p4 }
  0x54   : > { %p1969_p9 = pneg %p1968_p7 }
  0x56   : > { %p1976_p12 = pnand %p1975_p11, %p1969_p9 }
  0x58   : > { %1979 = shalt.err (!%p1976_p12)
}
  0x59   : > { %1778 = dma.hbm_to_vmem [thread:$0]  (!%p2293_p6), %s2678_s9, 1024, %s2299_s20, [#allocation12], %s2686_s22, %s2686_s22, %s2178_s13  }
  0x5a   : > { %s2179_s8 = smov [#allocation7]   ;;  %s2180_s12 = smov [#allocation10]  }
  0x5b   : > { %s369_s10 = sshll.u32 %s2179_s8, 4  ;;  %s401_s23 = sshll.u32 %s2180_s12, 4  ;;  %s370_s10 = int_to_ptr.vmem [resolvable:$true] %s369_s10  ;;  %s402_s23 = int_to_ptr.vmem [resolvable:$true] %s401_s23 }
  0x5c   : > { %s1980_s19 = scalar_lea.hbm %s2672_s3, 1024 }
  0x5d   : > { %p1981_p13 = scmp.ne.s32.totalorder %s2672_s3, %s1980_s19  ;;  %p1987_p5 = scmp.lt.u32.totalorder %s1980_s19, %s2672_s3 }
  0x5f   : > { %p1983_p0 = pnand %p1981_p13, %p2309_p8 }
  0x61   : > { %p1984_p2 = pneg %p1983_p0 }
  0x63   : > { %p1989_p7 = pnand %p1987_p5, %p1984_p2 }
  0x65   : > { %1992 = shalt.err (!%p1989_p7)
}
  0x66   : > { %s1993_s20 = scalar_lea.vmem %s370_s10, 1024  ;;  %p2001_p11 = scmp.lt.s32.totalorder %s370_s10, %s370_s10 }
  0x67   : > { %p1994_p9 = scmp.ne.s32.totalorder %s370_s10, %s1993_s20  ;;  %p2002_p12 = scmp.lt.s32.totalorder %s1993_s20, %s1993_s20 }
  0x69   : > { %p1996_p4 = pnand %p1994_p9, %p2309_p8  ;;  %p2003_p1 = por %p2002_p12, %p2001_p11 }
  0x6b   : > { %p1997_p10 = pneg %p1996_p4 }
  0x6d   : > { %p2004_p3 = pnand %p2003_p1, %p1997_p10 }
  0x6f   : > { %2007 = shalt.err (!%p2004_p3)
}
  0x70   : > { %1769 = dma.hbm_to_vmem [thread:$0]  (!%p2293_p6), %s2672_s3, 1024, %s370_s10, [#allocation6], %s2686_s22, %s2686_s22, %s2178_s13  }
  0x71   : > { %s2008_s24 = scalar_lea.hbm %s2676_s7, 1024 }
  0x72   : > { %p2009_p1 = scmp.ne.s32.totalorder %s2676_s7, %s2008_s24  ;;  %p2015_p0 = scmp.lt.u32.totalorder %s2008_s24, %s2676_s7 }
  0x74   : > { %p2011_p3 = pnand %p2009_p1, %p2309_p8 }
  0x76   : > { %p2012_p13 = pneg %p2011_p3 }
  0x78   : > { %p2017_p2 = pnand %p2015_p0, %p2012_p13 }
  0x7a   : > { %2020 = shalt.err (!%p2017_p2)
}
  0x7b   : > { %s2021_s30 = scalar_lea.vmem %s402_s23, 1024  ;;  %p2029_p4 = scmp.lt.s32.totalorder %s402_s23, %s402_s23 }
  0x7c   : > { %p2022_p5 = scmp.ne.s32.totalorder %s402_s23, %s2021_s30  ;;  %p2030_p10 = scmp.lt.s32.totalorder %s2021_s30, %s2021_s30 }
  0x7e   : > { %p2024_p7 = pnand %p2022_p5, %p2309_p8  ;;  %p2031_p11 = por %p2030_p10, %p2029_p4 }
  0x80   : > { %p2025_p9 = pneg %p2024_p7 }
  0x82   : > { %p2032_p12 = pnand %p2031_p11, %p2025_p9 }
  0x84   : > { %2035 = shalt.err (!%p2032_p12)
}
  0x85   : > { %1775 = dma.hbm_to_vmem [thread:$0]  (!%p2293_p6), %s2676_s7, 1024, %s402_s23, [#allocation9], %s2686_s22, %s2686_s22, %s2178_s13  }
  0x86   : > { %s2181_s1 = smov [#allocation13]   ;;  %s2036_s24 = scalar_lea.hbm %s2680_s11, 1024 }
  0x87   : > { %s433_s6 = sshll.u32 %s2181_s1, 4  ;;  %p2037_p1 = scmp.ne.s32.totalorder %s2680_s11, %s2036_s24  ;;  %s434_s6 = int_to_ptr.vmem [resolvable:$true] %s433_s6 }
  0x88   : > { %p2043_p0 = scmp.lt.u32.totalorder %s2036_s24, %s2680_s11 }
  0x89   : > { %p2039_p3 = pnand %p2037_p1, %p2309_p8 }
  0x8b   : > { %p2040_p13 = pneg %p2039_p3 }
  0x8d   : > { %p2045_p2 = pnand %p2043_p0, %p2040_p13 }
  0x8f   : > { %2048 = shalt.err (!%p2045_p2)
}
  0x90   : > { %s2049_s23 = scalar_lea.vmem %s434_s6, 1024  ;;  %p2057_p4 = scmp.lt.s32.totalorder %s434_s6, %s434_s6 }
  0x91   : > { %p2050_p5 = scmp.ne.s32.totalorder %s434_s6, %s2049_s23  ;;  %p2058_p10 = scmp.lt.s32.totalorder %s2049_s23, %s2049_s23 }
  0x93   : > { %p2052_p7 = pnand %p2050_p5, %p2309_p8  ;;  %p2059_p11 = por %p2058_p10, %p2057_p4 }
  0x95   : > { %p2053_p9 = pneg %p2052_p7 }
  0x97   : > { %p2060_p12 = pnand %p2059_p11, %p2053_p9 }
  0x99   : > { %2063 = shalt.err (!%p2060_p12)
}
  0x9a   : > { %1781 = dma.hbm_to_vmem [thread:$0]  (!%p2293_p6), %s2680_s11, 1024, %s434_s6, [#allocation12], %s2686_s22, %s2686_s22, %s2178_s13  }
  0x9b   : > { %s1471_s18 = sadd.s32 4294967294, %s2172_s28   ;;  %s2450_s16 = sadd.s32 1, %s2172_s28  }
  0x9c   : > { %s36_s20 = ssub.s32 %s2172_s28, %s2450_s16  ;;  %s39_s1 = sadd.s32 1, %s2168_s27 }
  0x9d   : > { %p37_p8 = scmp.eq.s32.totalorder %s36_s20, 0  ;;  %p46_p1 = scmp.ne.s32.totalorder %s2168_s27, %s2164_s26 }
  0x9e   : > { %p47_p3 = scmp.eq.s32.totalorder %s2172_s28, 0  ;;  %p52_p13 = scmp.ne.s32.totalorder %s2164_s26, %s2160_s25 }
  0x9f   : > { %s2461_s8 = scalar_select %p37_p8, %s2168_s27, %s39_s1  }
  0xa0   : > { %p2463_p0 = por %p47_p3, %p46_p1  ;;  %p2699_p2 = scmp.eq.s32.totalorder %s2277_s14, 0 }
  0xa1   : > { %p328_p5 = scmp.eq.s32.totalorder %s2277_s14, 1  ;;  %p334_p7 = scmp.eq.s32.totalorder %s1471_s18, 1 }
  0xa2   : > { %p2469_p6 = por %p2699_p2, %p52_p13  ;;  %p1796_p9 = scmp.lt.s32.totalorder %s2172_s28, 2 }
  0xa3   : > { %s450_s24 = sand.u32 1, %s2168_s27   ;;  %p2476_p4 = por %p328_p5, %p46_p1 }
  0xa4   : > { %p2480_p10 = por %p334_p7, %p52_p13  ;;  %s1480_s21 = sshll.u32 %s450_s24, 4 }
  0xa5   : > { %s2701_s29 = scalar_select %p2476_p4, 1, 0 }
  0xa6   : > { %s2702_s19 = scalar_select %p2480_p10, 1, 0 }
  0xa7   : > { %s1553_s17 = sshll.u32 %s2172_s28, 8  ;;  %s454_s18 = scalar_lea.vmem [#allocation2], %s1480_s21 }
  0xa8   : > { %s2488_s10 = scalar_lea.hbm %s2669_s0, %s1553_s17  ;;  %s461_s20 = sshll.u32 %s454_s18, 4  ;;  %s2490_s20 = int_to_ptr.vmem [resolvable:$true] %s461_s20 }
  0xa9   : > { %p2494_p11 = pnand %p1796_p9, %p2463_p0  ;;  %s2498_s22 = scalar_lea.sflag [#allocation3], %s450_s24 }
  0xaa   : > { %s2064_s23 = scalar_lea.hbm %s2488_s10, 256  ;;  %s2069_s12 = scalar_lea.hbm %s2669_s0, 512 }
  0xab   : > { %p2065_p12 = scmp.ne.s32.totalorder %s2488_s10, %s2064_s23  ;;  %p2066_p8 = pneg %p2494_p11 }
  0xac   : > { %p2070_p13 = scmp.lt.u32.totalorder %s2488_s10, %s2669_s0  ;;  %p2071_p0 = scmp.lt.u32.totalorder %s2069_s12, %s2064_s23 }
  0xad   : > { %p2067_p1 = pnand %p2066_p8, %p2065_p12  ;;  %p2073_p5 = scmp.lt.u32.totalorder %s2064_s23, %s2488_s10 }
  0xae   : > { %p2072_p2 = por %p2071_p0, %p2070_p13 }
  0xaf   : > { %p2068_p3 = pneg %p2067_p1 }
  0xb0   : > { %p2074_p7 = por %p2073_p5, %p2072_p2 }
  0xb2   : > { %p2075_p9 = pnand %p2074_p7, %p2068_p3 }
  0xb4   : > { %2078 = shalt.err (!%p2075_p9)
}
  0xb5   : > { %s2079_s24 = scalar_lea.vmem %s2490_s20, 256  ;;  %s2182_s21 = smov [#allocation2]  }
  0xb6   : > { %p2080_p12 = scmp.ne.s32.totalorder %s2490_s20, %s2079_s24  ;;  %s2084_s17 = sshll.u32 %s2182_s21, 4  ;;  %s2085_s17 = int_to_ptr.vmem [resolvable:$false] %s2084_s17 }
  0xb7   : > { %s2086_s30 = scalar_lea.vmem %s2085_s17, 512  ;;  %p2087_p4 = scmp.lt.s32.totalorder %s2490_s20, %s2085_s17 }
  0xb8   : > { %p2082_p1 = pnand %p2080_p12, %p2066_p8  ;;  %p2088_p13 = scmp.lt.s32.totalorder %s2086_s30, %s2079_s24 }
  0xba   : > { %p2083_p10 = pneg %p2082_p1  ;;  %p2089_p0 = por %p2088_p13, %p2087_p4 }
  0xbc   : > { %p2090_p2 = pnand %p2089_p0, %p2083_p10 }
  0xbe   : > { %2093 = shalt.err (!%p2090_p2)
}
  0xbf   : > { %s2704_s23 = smov 64   ;;  %p2705_p8 = scmp.ne.s32.totalorder %s2694_s15, 0 }
  0xc0   : > { %1785 = dma.hbm_to_vmem [thread:$0]  (!%p2494_p11), %s2488_s10, 256, %s2490_s20, %s2498_s22, %s2704_s23, %s2704_s23, %s2178_s13  }
  0xc1   : > { %473 = sbr.rel (%p2705_p8) target bundleno = 1590 (0x636), region = 72  ;;  %s2532_s12 = sand.u32 (!%p2705_p8), 1, %s2164_s26  }
  0xc2   : > { %s1484_s18 = sshll.u32 (!%p2705_p8), %s2532_s12, 4  ;;  %s476_s24 = scalar_lea.sflag (!%p2705_p8), [#allocation3], %s2532_s12 }
  0xc3   : > { %s2536_s21 = scalar_lea.vmem (!%p2705_p8), [#allocation2], %s1484_s18 }
  0xc8   : > { %2139 = dma.done.wait (%p2469_p6), %s476_s24, 256  }
  0xc9   : > { %2141 = vsyncadd (%p2469_p6), %s476_s24, 4294967040  ;;  %p2706_p4 = scmp.eq.s32.totalorder %s2277_s14, 0 }
  0xcb   : > { %2143 = dma.done.wait (%p2706_p4), [#allocation6], 2048   ;;  %p2707_p10 = pmov %p2706_p4 }
  0xcc   : > { %p2708_p11 = pmov %p2706_p4 }
  0xcd   : > { %2145 = vsyncadd (%p2707_p10), [#allocation6], 4294965248 }
  0xce   : > { %2147 = dma.done.wait (%p2708_p11), [#allocation9], 2048   ;;  %p2709_p3 = pmov %p2706_p4 }
  0xd0   : > { %2149 = vsyncadd (%p2709_p3), [#allocation9], 4294965248  ;;  %p2710_p5 = pmov %p2709_p3 }
  0xd1   : > { %p2711_p7 = pmov %p2709_p3 }
  0xd2   : > { %2151 = dma.done.wait (%p2710_p5), [#allocation12], 2048  }
  0xd3   : > { %2153 = vsyncadd (%p2711_p7), [#allocation12], 4294965248  ;;  %v1846_v0 = vld [vmem:[#allocation5] sm:$0xff]   ;;  %v1847_v1 = vld [vmem:[#allocation5 + $0x8] sm:$0xff]   ;;  %s2712_s1 = sld [smem:[#allocation21_spill]]  ;;  %s2713_s23 = sld [smem:[#allocation22_spill]] }
  0xd4   : > { %1615 = vmatprep.subr.bf16.mxu0 %v1846_v0  ;;  %v1848_v2 = vld [vmem:[#allocation5 + $0x10] sm:$0xff]   ;;  %v1849_v3 = vld [vmem:[#allocation5 + $0x18] sm:$0xff]   ;;  %v1856_v5 = vld [vmem:[#allocation7] sm:$0xff]   ;;  %s1491_s15 = sshll.u32 %s2532_s12, 5  ;;  %s2715_s6 = sld [smem:[#allocation24_spill]] }
  0xd5   : > { %1616 = vmatpush3.bf16.msra.mxu0 %v1846_v0  ;;  %v1854_v4 = vld [vmem:[%s2536_s21] sm:$0xff]   ;;  %v1857_v6 = vld [vmem:[#allocation7 + $0x8] sm:$0xff]   ;;  %1635 = vmatprep.subr.bf16.mxu1 %v1856_v5  ;;  %v1859_v10 = vld [vmem:[#allocation7 + $0x18] sm:$0xff]   ;;  %s545_s10 = scalar_lea.vmem [#allocation14], %s1491_s15  ;;  %p2717_p9 = scmp.ne.s32.totalorder %s2701_s29, 0 }
  0xd6   : > { %1617 = vmatprep.subr.bf16.mxu0 %v1847_v1  ;;  %1631 = vmatprep.mubr.bf16.mxu0 %v1854_v4  ;;  %v1850_v7 = vld [vmem:[#allocation5 + $0x20] sm:$0xff]   ;;  %v1858_v8 = vld [vmem:[#allocation7 + $0x10] sm:$0xff]   ;;  %v1851_v9 = vld [vmem:[#allocation5 + $0x28] sm:$0xff]   ;;  %s1341_s20 = sshll.u32 %s545_s10, 4  ;;  %s2620_s20 = int_to_ptr.vmem [resolvable:$true] %s1341_s20 }
  0xd7   : > { %1636 = vmatpush3.bf16.msra.mxu1 %v1856_v5  ;;  %v1852_v11 = vld [vmem:[#allocation5 + $0x30] sm:$0xff]   ;;  %v1860_v12 = vld [vmem:[#allocation7 + $0x20] sm:$0xff]   ;;  %v1853_v13 = vld [vmem:[#allocation5 + $0x38] sm:$0xff]   ;;  %s2094_s24 = scalar_lea.vmem %s2620_s20, 512 }
  0xd8   : > { %1637 = vmatprep.subr.bf16.mxu1 %v1857_v6  ;;  %v1861_v14 = vld [vmem:[#allocation7 + $0x28] sm:$0xff]   ;;  %v1862_v16 = vld [vmem:[#allocation7 + $0x30] sm:$0xff]   ;;  %v1863_v17 = vld [vmem:[#allocation7 + $0x38] sm:$0xff]   ;;  %p2095_p6 = scmp.ne.s32.totalorder %s2620_s20, %s2094_s24 }
  0xd9   : > { %1618 = vmatpush3.bf16.msra.mxu0 %v1847_v1  ;;  %v1855_v15 = vld [vmem:[%s2536_s21 + $0x8] sm:$0xff]   ;;  %v1864_v18 = vld [vmem:[#allocation8] sm:$0xff]   ;;  %v1866_v20 = vld [vmem:[#allocation8 + $0x10] sm:$0xff]   ;;  %s2714_s21 = sld [smem:[#allocation23_spill]] }
  0xda   : > { %1619 = vmatprep.subr.bf16.mxu0 %v1848_v2  ;;  %v1865_v19 = vld [vmem:[#allocation8 + $0x8] sm:$0xff]   ;;  %v1867_v21 = vld [vmem:[#allocation8 + $0x18] sm:$0xff]   ;;  %v1868_v22 = vld [vmem:[#allocation8 + $0x20] sm:$0xff]   ;;  %p2096_p12 = pnand %p2095_p6, %p2717_p9 }
  0xdb   : > { %1638 = vmatpush3.bf16.msra.mxu1 %v1857_v6  ;;  %v1869_v23 = vld [vmem:[#allocation8 + $0x28] sm:$0xff]   ;;  %v1492_v24 = vld [vmem:[%s2671_s2] ss:$0 sm:$0xff]  ;;  %v1870_v39 = vld [vmem:[#allocation8 + $0x30] sm:$0xff]  }
  0xdc   : > { %1639 = vmatprep.subr.bf16.mxu1 %v1858_v8  ;;  %v1871_v40 = vld [vmem:[#allocation8 + $0x38] sm:$0xff]   ;;  %v1872_v41 = vld [vmem:[#allocation10] sm:$0xff]   ;;  %v1873_v42 = vld [vmem:[#allocation10 + $0x8] sm:$0xff]   ;;  %p2097_p1 = pneg %p2096_p12 }
  0xdd   : > { %1620 = vmatpush3.bf16.msra.mxu0 %v1848_v2  ;;  %v1874_v43 = vld [vmem:[#allocation10 + $0x10] sm:$0xff]   ;;  %v1875_v44 = vld [vmem:[#allocation10 + $0x18] sm:$0xff]   ;;  %v1876_v45 = vld [vmem:[#allocation10 + $0x20] sm:$0xff]  }
  0xde   : > { %1621 = vmatprep.subr.bf16.mxu0 %v1849_v3  ;;  %v1503_v46 = vld [vmem:[%s2673_s4] ss:$0 sm:$0xff]  ;;  %v1877_v61 = vld [vmem:[#allocation10 + $0x28] sm:$0xff]   ;;  %v1878_v62 = vld [vmem:[#allocation10 + $0x30] sm:$0xff]  }
  0xdf   : > { %1640 = vmatpush3.bf16.msra.mxu1 %v1858_v8  ;;  %v1879_v63 = vld [vmem:[#allocation10 + $0x38] sm:$0xff]   ;;  %v1880_v0 = vld [vmem:[#allocation11] sm:$0xff]   ;;  %v1881_v1 = vld [vmem:[#allocation11 + $0x8] sm:$0xff]  }
  0xe0   : > { %1641 = vmatprep.subr.bf16.mxu1 %v1859_v10  ;;  %v1882_v2 = vld [vmem:[#allocation11 + $0x10] sm:$0xff]   ;;  %v1884_v4 = vld [vmem:[#allocation11 + $0x20] sm:$0xff]   ;;  %v1885_v5 = vld [vmem:[#allocation11 + $0x28] sm:$0xff]  }
  0xe1   : > { %1622 = vmatpush3.bf16.msra.mxu0 %v1849_v3  ;;  %v1883_v3 = vld [vmem:[#allocation11 + $0x18] sm:$0xff]   ;;  %v1512_v6 = vld [vmem:[%s2712_s1] ss:$0 sm:$0xff]  ;;  %s1554_s1 = sshll.u32 %s2277_s14, 9  ;;  %s1328_s14 = scalar_lea.sflag [#allocation4], %s2532_s12 }
  0xe2   : > { %1623 = vmatprep.subr.bf16.mxu0 %v1850_v7 }
  0xe3   : > { %1642 = vmatpush3.bf16.msra.mxu1 %v1859_v10 }
  0xe4   : > { %1643 = vmatprep.subr.bf16.mxu1 %v1860_v12 }
  0xe5   : > { %1624 = vmatpush3.bf16.msra.mxu0 %v1850_v7 }
  0xe6   : > { %1625 = vmatprep.subr.bf16.mxu0 %v1851_v9 }
  0xe7   : > { %1644 = vmatpush3.bf16.msra.mxu1 %v1860_v12 }
  0xe8   : > { %1645 = vmatprep.subr.bf16.mxu1 %v1861_v14 }
  0xe9   : > { %1626 = vmatpush3.bf16.msra.mxu0 %v1851_v9 }
  0xea   : > { %1627 = vmatprep.subr.bf16.mxu0 %v1852_v11 }
  0xeb   : > { %1646 = vmatpush3.bf16.msra.mxu1 %v1861_v14 }
  0xec   : > { %1647 = vmatprep.subr.bf16.mxu1 %v1862_v16 }
  0xed   : > { %1628 = vmatpush3.bf16.msra.mxu0 %v1852_v11 }
  0xee   : > { %1629 = vmatprep.subr.bf16.mxu0 %v1853_v13 }
  0xef   : > { %1648 = vmatpush3.bf16.msra.mxu1 %v1862_v16 }
  0xf0   : > { %1649 = vmatprep.subr.bf16.mxu1 %v1863_v17 }
  0xf1   : > { %1630 = vmatpush3.bf16.msra.mxu0 %v1853_v13 }
  0xf2   : > { %1655 = vmatprep.subr.bf16.mxu0 %v1864_v18 }
  0xf3   : > { %1650 = vmatpush3.bf16.msra.mxu1 %v1863_v17 }
  0xf4   : > { %1632 = vmatmul.mubr.bf16.vlgmr.msra.gmra.mrb[0].mxu0 %v1855_v15  ;;  %1675 = vmatprep.subr.bf16.mxu1 %v1872_v41 }
  0xf5   : > { %1656 = vmatpush3.bf16.msra.mxu0 %v1864_v18 }
  0xf6   : > { %1657 = vmatprep.subr.bf16.mxu0 %v1865_v19 }
  0xf9   : > { %1658 = vmatpush3.bf16.msra.mxu0 %v1865_v19 }
  0xfa   : > { %1659 = vmatprep.subr.bf16.mxu0 %v1866_v20 }
  0xfd   : > { %1660 = vmatpush3.bf16.msra.mxu0 %v1866_v20 }
  0xfe   : > { %1661 = vmatprep.subr.bf16.mxu0 %v1867_v21 }
 0x101   : > { %1662 = vmatpush3.bf16.msra.mxu0 %v1867_v21 }
 0x102   : > { %1663 = vmatprep.subr.bf16.mxu0 %v1868_v22 }
 0x105   : > { %1664 = vmatpush3.bf16.msra.mxu0 %v1868_v22 }
 0x106   : > { %1665 = vmatprep.subr.bf16.mxu0 %v1869_v23 }
 0x109   : > { %1666 = vmatpush3.bf16.msra.mxu0 %v1869_v23 }
 0x10a   : > { %1667 = vmatprep.subr.bf16.mxu0 %v1870_v39 }
 0x10d   : > { %1668 = vmatpush3.bf16.msra.mxu0 %v1870_v39 }
 0x10e   : > { %1669 = vmatprep.subr.bf16.mxu0 %v1871_v40 }
 0x111   : > { %1670 = vmatpush3.bf16.msra.mxu0 %v1871_v40 }
 0x112   : > { %1695 = vmatprep.subr.bf16.mxu0 %v1880_v0 }
 0x1c7   : > { %v1633_v25 = vpop.f32.mrb[0].mxu0 }
 0x1c8   : > { %v670_v26 = vpop.f32.mrb[1].mxu0  ;;  %v2561_v29 = vadd.f32 %v1633_v25, %v1492_v24  ;;  %v1886_v25 = vld [vmem:[#allocation11 + $0x30] sm:$0xff]  }
 0x1c9   : > { %v2559_v27 = vadd.f32 %v1492_v24, %v670_v26  ;;  %v1634_v28 = vpop.f32.mrb[2].mxu0  ;;  %v1887_v26 = vld [vmem:[#allocation11 + $0x38] sm:$0xff]  }
 0x1ca   : > { %v2563_v30 = vadd.f32 %v1634_v28, %v1492_v24  ;;  %v673_v31 = vpop.f32.mrb[3].mxu0  ;;  %v687_v36 = vmax.f32 %v2561_v29, 0.0  ;;  %v1889_v28 = vld [vmem:[#allocation13 + $0x8] sm:$0xff]   ;;  %v1890_v29 = vld [vmem:[#allocation13 + $0x10] sm:$0xff]  }
 0x1cb   : > { %v2565_v32 = vadd.f32 %v1492_v24, %v673_v31  ;;  %v685_v34 = vmax.f32 %v2559_v27, 0.0  ;;  %v1888_v27 = vld [vmem:[#allocation13] sm:$0xff]  }
 0x1cc   : > { %v688_v33 = vmax.f32 %v2563_v30, 0.0  ;;  %v1891_v30 = vld [vmem:[#allocation13 + $0x18] sm:$0xff]   ;;  %v1892_v31 = vld [vmem:[#allocation13 + $0x20] sm:$0xff]  }
 0x1cd   : > { %v686_v35 = vmax.f32 %v2565_v32, 0.0  ;;  %v1521_v32 = vld [vmem:[%s2713_s23] ss:$0 sm:$0xff]  ;;  %s2716_s23 = sld [smem:[#allocation25_spill]] }
 0x1ce   : > { %v690_v38 = vpack.c.bf16 %v688_v33, %v687_v36 }
 0x1cf   : > { %v689_v37 = vpack.c.bf16 %v686_v35, %v685_v34 }
 0x1d1   : > { %1651 = vmatprep.mubr.bf16.mxu1 %v689_v37 }
 0x1d2   : > { %1652 = vmatmul.mubr.bf16.vlgmr.msra.gmra.mrb[0].mxu1 %v690_v38 }
 0x1d3   : > { %1676 = vmatpush3.bf16.msra.mxu1 %v1872_v41  ;;  %s2625_s18 = scalar_lea.hbm %s2716_s23, %s1554_s1 }
 0x1d4   : > { %1677 = vmatprep.subr.bf16.mxu1 %v1873_v42 }
 0x1d7   : > { %1678 = vmatpush3.bf16.msra.mxu1 %v1873_v42 }
 0x1d8   : > { %1679 = vmatprep.subr.bf16.mxu1 %v1874_v43 }
 0x1db   : > { %1680 = vmatpush3.bf16.msra.mxu1 %v1874_v43 }
 0x1dc   : > { %1681 = vmatprep.subr.bf16.mxu1 %v1875_v44 }
 0x1df   : > { %1682 = vmatpush3.bf16.msra.mxu1 %v1875_v44 }
 0x1e0   : > { %1683 = vmatprep.subr.bf16.mxu1 %v1876_v45 }
 0x1e3   : > { %1684 = vmatpush3.bf16.msra.mxu1 %v1876_v45 }
 0x1e4   : > { %1685 = vmatprep.subr.bf16.mxu1 %v1877_v61 }
 0x1e7   : > { %1686 = vmatpush3.bf16.msra.mxu1 %v1877_v61 }
 0x1e8   : > { %1687 = vmatprep.subr.bf16.mxu1 %v1878_v62 }
 0x1eb   : > { %1688 = vmatpush3.bf16.msra.mxu1 %v1878_v62 }
 0x1ec   : > { %1689 = vmatprep.subr.bf16.mxu1 %v1879_v63 }
 0x1ef   : > { %1690 = vmatpush3.bf16.msra.mxu1 %v1879_v63 }
 0x1f0   : > { %1715 = vmatprep.subr.bf16.mxu1 %v1888_v27 }
 0x2a5   : > { %v1653_v47 = vpop.f32.mrb[0].mxu1 }
 0x2a6   : > { %v805_v48 = vadd.f32 %v1653_v47, %v1503_v46  ;;  %v796_v49 = vpop.f32.mrb[1].mxu1  ;;  %v1893_v47 = vld [vmem:[#allocation13 + $0x28] sm:$0xff]  }
 0x2a7   : > { %v797_v50 = vadd.f32 %v1503_v46, %v796_v49  ;;  %v1654_v51 = vpop.f32.mrb[2].mxu1  ;;  %v1895_v49 = vld [vmem:[#allocation13 + $0x38] sm:$0xff]  }
 0x2a8   : > { %v808_v52 = vadd.f32 %v1654_v51, %v1503_v46  ;;  %v799_v53 = vpop.f32.mrb[3].mxu1  ;;  %v813_v55 = vmax.f32 %v805_v48, 0.0  ;;  %v1894_v48 = vld [vmem:[#allocation13 + $0x30] sm:$0xff]  }
 0x2a9   : > { %v800_v54 = vadd.f32 %v1503_v46, %v799_v53  ;;  %v811_v57 = vmax.f32 %v797_v50, 0.0  ;;  %v1530_v50 = vld [vmem:[%s2714_s21] ss:$0 sm:$0xff]  ;;  %s2183_s21 = smov [#allocation14]  }
 0x2aa   : > { %v814_v56 = vmax.f32 %v808_v52, 0.0  ;;  %s2098_s15 = sshll.u32 %s2183_s21, 4  ;;  %s2099_s15 = int_to_ptr.vmem [resolvable:$false] %s2098_s15 }
 0x2ab   : > { %v812_v58 = vmax.f32 %v800_v54, 0.0  ;;  %s2100_s22 = scalar_lea.vmem %s2099_s15, 1024  ;;  %p2101_p13 = scmp.lt.s32.totalorder %s2620_s20, %s2099_s15 }
 0x2ac   : > { %v816_v59 = vpack.c.bf16 %v814_v56, %v813_v55  ;;  %p2102_p0 = scmp.lt.s32.totalorder %s2100_s22, %s2094_s24 }
 0x2ad   : > { %v815_v60 = vpack.c.bf16 %v812_v58, %v811_v57 }
 0x2ae   : > { %p2103_p2 = por %p2102_p0, %p2101_p13 }
 0x2af   : > { %1671 = vmatprep.mubr.bf16.mxu0 %v815_v60 }
 0x2b0   : > { %1672 = vmatmul.mubr.bf16.vlgmr.msra.gmra.mrb[4].mxu0 %v816_v59  ;;  %p2104_p8 = pnand %p2103_p2, %p2097_p1 }
 0x2b1   : > { %1696 = vmatpush3.bf16.msra.mxu0 %v1880_v0 }
 0x2b2   : > { %1697 = vmatprep.subr.bf16.mxu0 %v1881_v1 }
 0x2b5   : > { %1698 = vmatpush3.bf16.msra.mxu0 %v1881_v1 }
 0x2b6   : > { %1699 = vmatprep.subr.bf16.mxu0 %v1882_v2 }
 0x2b9   : > { %1700 = vmatpush3.bf16.msra.mxu0 %v1882_v2 }
 0x2ba   : > { %1701 = vmatprep.subr.bf16.mxu0 %v1883_v3 }
 0x2bd   : > { %1702 = vmatpush3.bf16.msra.mxu0 %v1883_v3 }
 0x2be   : > { %1703 = vmatprep.subr.bf16.mxu0 %v1884_v4 }
 0x2c1   : > { %1704 = vmatpush3.bf16.msra.mxu0 %v1884_v4 }
 0x2c2   : > { %1705 = vmatprep.subr.bf16.mxu0 %v1885_v5 }
 0x2c5   : > { %1706 = vmatpush3.bf16.msra.mxu0 %v1885_v5  ;;  %v1539_v5 = vld [vmem:[%s2715_s6] ss:$0 sm:$0xff] }
 0x2c6   : > { %1707 = vmatprep.subr.bf16.mxu0 %v1886_v25 }
 0x2c9   : > { %1708 = vmatpush3.bf16.msra.mxu0 %v1886_v25 }
 0x2ca   : > { %1709 = vmatprep.subr.bf16.mxu0 %v1887_v26 }
 0x2cd   : > { %1710 = vmatpush3.bf16.msra.mxu0 %v1887_v26 }
 0x383   : > { %v1673_v7 = vpop.f32.mrb[4].mxu0 }
 0x384   : > { %v931_v8 = vadd.f32 %v1673_v7, %v1512_v6  ;;  %v922_v9 = vpop.f32.mrb[5].mxu0 }
 0x385   : > { %v923_v10 = vadd.f32 %v1512_v6, %v922_v9  ;;  %v1674_v11 = vpop.f32.mrb[6].mxu0 }
 0x386   : > { %v934_v12 = vadd.f32 %v1674_v11, %v1512_v6  ;;  %v925_v13 = vpop.f32.mrb[7].mxu0  ;;  %v939_v16 = vmax.f32 %v931_v8, 0.0 }
 0x387   : > { %v937_v14 = vmax.f32 %v923_v10, 0.0  ;;  %v926_v15 = vadd.f32 %v1512_v6, %v925_v13 }
 0x388   : > { %v940_v17 = vmax.f32 %v934_v12, 0.0  ;;  %v2599_v22 = vadd.f32 %v939_v16, %v687_v36 }
 0x389   : > { %v938_v18 = vmax.f32 %v926_v15, 0.0  ;;  %v2591_v20 = vadd.f32 %v937_v14, %v685_v34 }
 0x38a   : > { %v2587_v19 = vadd.f32 %v940_v17, %v688_v33 }
 0x38b   : > { %v2595_v21 = vadd.f32 %v938_v18, %v686_v35 }
 0x38c   : > { %v946_v24 = vpack.c.bf16 %v2587_v19, %v2599_v22 }
 0x38d   : > { %v945_v23 = vpack.c.bf16 %v2595_v21, %v2591_v20 }
 0x38f   : > { %1691 = vmatprep.mubr.bf16.mxu1 %v945_v23 }
 0x390   : > { %1692 = vmatmul.mubr.bf16.vlgmr.msra.gmra.mrb[4].mxu1 %v946_v24 }
 0x391   : > { %1716 = vmatpush3.bf16.msra.mxu1 %v1888_v27 }
 0x392   : > { %1717 = vmatprep.subr.bf16.mxu1 %v1889_v28 }
 0x395   : > { %1718 = vmatpush3.bf16.msra.mxu1 %v1889_v28 }
 0x396   : > { %1719 = vmatprep.subr.bf16.mxu1 %v1890_v29 }
 0x399   : > { %1720 = vmatpush3.bf16.msra.mxu1 %v1890_v29 }
 0x39a   : > { %1721 = vmatprep.subr.bf16.mxu1 %v1891_v30 }
 0x39d   : > { %1722 = vmatpush3.bf16.msra.mxu1 %v1891_v30 }
 0x39e   : > { %1723 = vmatprep.subr.bf16.mxu1 %v1892_v31 }
 0x3a1   : > { %1724 = vmatpush3.bf16.msra.mxu1 %v1892_v31 }
 0x3a2   : > { %1725 = vmatprep.subr.bf16.mxu1 %v1893_v47 }
 0x3a5   : > { %1726 = vmatpush3.bf16.msra.mxu1 %v1893_v47 }
 0x3a6   : > { %1727 = vmatprep.subr.bf16.mxu1 %v1894_v48 }
 0x3a9   : > { %1728 = vmatpush3.bf16.msra.mxu1 %v1894_v48 }
 0x3aa   : > { %1729 = vmatprep.subr.bf16.mxu1 %v1895_v49 }
 0x3ad   : > { %1730 = vmatpush3.bf16.msra.mxu1 %v1895_v49 }
 0x463   : > { %v1693_v33 = vpop.f32.mrb[4].mxu1 }
 0x464   : > { %v1061_v34 = vadd.f32 %v1693_v33, %v1521_v32  ;;  %v1052_v35 = vpop.f32.mrb[5].mxu1 }
 0x465   : > { %v1053_v36 = vadd.f32 %v1521_v32, %v1052_v35  ;;  %v1694_v37 = vpop.f32.mrb[6].mxu1 }
 0x466   : > { %v1064_v38 = vadd.f32 %v1694_v37, %v1521_v32  ;;  %v1055_v39 = vpop.f32.mrb[7].mxu1  ;;  %v1069_v41 = vmax.f32 %v1061_v34, 0.0 }
 0x467   : > { %v1056_v40 = vadd.f32 %v1521_v32, %v1055_v39  ;;  %v1067_v43 = vmax.f32 %v1053_v36, 0.0 }
 0x468   : > { %v1070_v42 = vmax.f32 %v1064_v38, 0.0 }
 0x469   : > { %v1068_v44 = vmax.f32 %v1056_v40, 0.0 }
 0x46a   : > { %v1072_v45 = vpack.c.bf16 %v1070_v42, %v1069_v41 }
 0x46b   : > { %v1071_v46 = vpack.c.bf16 %v1068_v44, %v1067_v43 }
 0x46d   : > { %1711 = vmatprep.mubr.bf16.mxu0 %v1071_v46 }
 0x46e   : > { %1712 = vmatmul.mubr.bf16.vlgmr.msra.gmra.mrb[8].mxu0 %v1072_v45 }
 0x541   : > { %v1713_v51 = vpop.f32.mrb[8].mxu0 }
 0x542   : > { %v1187_v52 = vadd.f32 %v1713_v51, %v1530_v50  ;;  %v1178_v53 = vpop.f32.mrb[9].mxu0 }
 0x543   : > { %v1179_v54 = vadd.f32 %v1530_v50, %v1178_v53  ;;  %v1714_v55 = vpop.f32.mrb[10].mxu0 }
 0x544   : > { %v1195_v56 = vmax.f32 %v1187_v52, 0.0  ;;  %v1190_v57 = vadd.f32 %v1714_v55, %v1530_v50  ;;  %v1181_v58 = vpop.f32.mrb[11].mxu0 }
 0x545   : > { %v1193_v59 = vmax.f32 %v1179_v54, 0.0  ;;  %v1182_v60 = vadd.f32 %v1530_v50, %v1181_v58 }
 0x546   : > { %v1196_v61 = vmax.f32 %v1190_v57, 0.0  ;;  %v1199_v63 = vadd.f32 %v1195_v56, %v2599_v22 }
 0x547   : > { %v1194_v62 = vmax.f32 %v1182_v60, 0.0  ;;  %v1197_v1 = vadd.f32 %v1193_v59, %v2591_v20 }
 0x548   : > { %v1200_v0 = vadd.f32 %v1196_v61, %v2587_v19 }
 0x549   : > { %v1198_v2 = vadd.f32 %v1194_v62, %v2595_v21 }
 0x54a   : > { %v1202_v3 = vpack.c.bf16 %v1200_v0, %v1199_v63 }
 0x54b   : > { %v1201_v4 = vpack.c.bf16 %v1198_v2, %v1197_v1 }
 0x54d   : > { %1731 = vmatprep.mubr.bf16.mxu1 %v1201_v4 }
 0x54e   : > { %1732 = vmatmul.mubr.bf16.vlgmr.msra.gmra.mrb[8].mxu1 %v1202_v3 }
 0x621   : > { %v1733_v6 = vpop.f32.mrb[8].mxu1 }
 0x622   : > { %v1317_v7 = vadd.f32 %v1733_v6, %v1539_v5  ;;  %v1308_v8 = vpop.f32.mrb[9].mxu1 }
 0x623   : > { %v1309_v9 = vadd.f32 %v1539_v5, %v1308_v8  ;;  %v1734_v10 = vpop.f32.mrb[10].mxu1 }
 0x624   : > { %1325 = vst [vmem:[%s545_s10 + $0x10] sm:$0xff] %v1317_v7  ;;  %v1320_v11 = vadd.f32 %v1734_v10, %v1539_v5  ;;  %v1311_v12 = vpop.f32.mrb[11].mxu1 }
 0x625   : > { %1323 = vst [vmem:[%s545_s10] sm:$0xff] %v1309_v9  ;;  %v1312_v13 = vadd.f32 %v1539_v5, %v1311_v12 }
 0x626   : > { %1326 = vst [vmem:[%s545_s10 + $0x18] sm:$0xff] %v1320_v11 }
 0x627   : > { %1324 = vst [vmem:[%s545_s10 + $0x8] sm:$0xff] %v1312_v13 }
 0x628   : > { %2107 = shalt.err (!%p2104_p8)
}
 0x629   : > { %s2108_s13 = scalar_lea.hbm %s2625_s18, 512  ;;  %s2112_s1 = scalar_lea.hbm %s2716_s23, 1024 }
 0x62a   : > { %p2109_p4 = scmp.ne.s32.totalorder %s2625_s18, %s2108_s13  ;;  %p2113_p3 = scmp.lt.u32.totalorder %s2625_s18, %s2716_s23 }
 0x62b   : > { %p2114_p5 = scmp.lt.u32.totalorder %s2112_s1, %s2108_s13  ;;  %p2116_p6 = scmp.lt.u32.totalorder %s2108_s13, %s2625_s18 }
 0x62c   : > { %p2110_p10 = pnand %p2109_p4, %p2717_p9 }
 0x62d   : > { %p2115_p7 = por %p2114_p5, %p2113_p3 }
 0x62e   : > { %p2111_p11 = pneg %p2110_p10 }
 0x62f   : > { %p2117_p12 = por %p2116_p6, %p2115_p7 }
 0x631   : > { %p2118_p1 = pnand %p2117_p12, %p2111_p11 }
 0x633   : > { %2121 = shalt.err (!%p2118_p1)
}
 0x634   : > { %s2184_s24 = smov 128   ;;  %s2185_s21 = smov 8  }
 0x635   : > { %1761 = dma.vmem_to_hbm [thread:$0]  (%p2717_p9), %s2620_s20, 512, %s2625_s18, %s1328_s14, %s2184_s24, %s2184_s24, %s2185_s21  }
 0x636 PF: > { %s1356_s15 = sand.u32 1, %s2160_s25   ;;  %p2718_p13 = scmp.ne.s32.totalorder %s2702_s19, 0 }
 0x637   : > { %p2719_p0 = scmp.ge.s32.totalorder %s2172_s28, 2  ;;  %s1357_s22 = scalar_lea.sflag [#allocation4], %s1356_s15 }
 0x639   : > { %p1787_p2 = pnand %p2719_p0, %p2718_p13 }
 0x63b   : > { %2155 = dma.done.wait (!%p1787_p2), %s1357_s22, 512  }
 0x63c   : > { %2157 = vsyncadd (!%p1787_p2), %s1357_s22, 4294966784  ;;  %p29_p8 = scmp.ge.s32.totalorder %s2450_s16, 4   ;;  %s2720_s25 = smov %s2164_s26 }
 0x63d   : > { %s2721_s26 = smov %s2168_s27  ;;  %s2722_s27 = smov %s2461_s8 }
 0x63e   : > { %s2723_s28 = smov %s2450_s16  ;;  %31 = sbr.rel (!%p29_p8) target bundleno = 15 (0xf), region = 141 }
 0x645   :  { %1362 = vsyncpa [#allocation3], 1 }
 0x646   :  { %1364 = vsyncpa [#allocation3 + $0x1], 1 }
 0x647   :  { %1365 = vsyncpa [#allocation6], 1 }
 0x648   :  { %1366 = vsyncpa [#allocation9], 1 }
 0x649   :  { %1367 = vsyncpa [#allocation12], 1 }
 0x64a   :  { %1368 = vsyncpa [#allocation4], 1 }
 0x64b   :  { %1370 = vsyncpa [#allocation4 + $0x1], 1 }

</bundles_post_ra>
